<compile_context>
chip_gen: v6e
topology: v6e:2x2x1
jax: 0.10.0
libtpu: 0.0.40
codegen_flags: <defaults>
</compile_context>

<pallas_src>
import functools

import jax
import jax.numpy as jnp
from jax.experimental import pallas as pl
from jax.experimental.pallas import tpu as pltpu


# ----------------------------------------------------------------------------
# Pallas kernel: fused FCOS head decode over one lane-dense tile of points.
#   cls_ref : [NCp, TN]  raw class logits (padded class rows = -1e30)
#   aux_ref : [8,  TN]   rows 0-3 reg l/t/r/b, 4 centerness, 5-6 point x/y,
#                        7 valid mask (1 real point / 0 padded tail)
# Output:
#   out_ref : [8, TN]    rows 0 score, 1 class idx (f32), 2-5 x1,y1,x2,y2,
#                        6-7 zeros (padding) — single dense store.
# ----------------------------------------------------------------------------
def _decode_kernel(cls_ref, aux_ref, out_ref, *, image_w, image_h):
    cls = cls_ref[...].astype(jnp.float32)          # [NCp, TN]
    aux = aux_ref[...].astype(jnp.float32)          # [8,  TN]

    # Dense max over the class (sublane) axis; argmax via iota+min keeps
    # first-index tie semantics like torch.max. Sigmoid is monotonic, so the
    # argmax on logits equals the argmax on probabilities.
    best = jnp.max(cls, axis=0, keepdims=True)                        # [1, TN]
    idx = jax.lax.broadcasted_iota(jnp.int32, cls.shape, 0).astype(jnp.float32)
    sentinel = jnp.float32(cls.shape[0])
    best_idx = jnp.min(jnp.where(cls == best, idx, sentinel),
                       axis=0, keepdims=True)                         # [1, TN]

    ctr = aux[4:5, :]
    valid = aux[7:8, :]
    # sigmoid via EUP exp + approx reciprocal (vrcp slot, essentially free).
    max_prob = pl.reciprocal(1.0 + jnp.exp(-best), approx=True)
    ctr_prob = pl.reciprocal(1.0 + jnp.exp(-ctr), approx=True)
    score = jnp.sqrt(max_prob * ctr_prob) * valid     # padded tail -> score 0

    reg = jnp.exp(aux[0:4, :])                        # [4, TN]
    l, t = reg[0:1, :], reg[1:2, :]
    r, b = reg[2:3, :], reg[3:4, :]
    px, py = aux[5:6, :], aux[6:7, :]

    # trunc-toward-zero in f32 matches torch .int(); clamp exactly like the
    # reference (x1/y1 min-clamped only, x2/y2 max-clamped only).
    x1 = jnp.maximum(jnp.trunc(px - l), 0.0)
    y1 = jnp.maximum(jnp.trunc(py - t), 0.0)
    x2 = jnp.minimum(jnp.trunc(px + r), jnp.float32(image_w - 1))
    y2 = jnp.minimum(jnp.trunc(py + b), jnp.float32(image_h - 1))

    zeros = jnp.zeros_like(score)
    out_ref[...] = jnp.concatenate(
        [score, best_idx, x1, y1, x2, y2, zeros, zeros], axis=0)


def _choose_tile_n(n_total, nc_pad, *, min_tile=512, max_tile=32768,
                   vmem_data_budget=20 * 1024 * 1024):
    """Largest multiple of 512 whose double-buffered working set fits the
    budget (v7x-safe), capped so the grid has >= 2 tiles whenever possible."""
    rows = nc_pad + 8 + 8                       # cls-in + aux-in + out slab
    bytes_per_lane = rows * 4 * 2               # f32, double-buffered
    cap = (vmem_data_budget // bytes_per_lane) // min_tile * min_tile
    tile = max(min_tile, min(max_tile, cap))
    half = (n_total + 1) // 2
    half_up = ((half + min_tile - 1) // min_tile) * min_tile
    return max(min_tile, min(tile, half_up))


def decode_all_points_pallas(cls_t, aux_t, *, image_w, image_h, tile_n):
    """cls_t [NCp, Npad], aux_t [8, Npad] -> out slab [8, Npad]."""
    nc_pad, n_pad = cls_t.shape
    assert n_pad % tile_n == 0 and aux_t.shape == (8, n_pad)

    def lane_spec(rows):
        return pl.BlockSpec((rows, tile_n), lambda i: (0, i))

    kernel = functools.partial(_decode_kernel, image_w=image_w, image_h=image_h)
    return pl.pallas_call(
        kernel,
        grid=(n_pad // tile_n,),
        in_specs=[lane_spec(nc_pad), lane_spec(8)],
        out_specs=lane_spec(8),
        out_shape=jax.ShapeDtypeStruct((8, n_pad), jnp.float32),
        compiler_params=pltpu.CompilerParams(
            dimension_semantics=("parallel",),
            vmem_limit_bytes=32 * 1024 * 1024),
    )(cls_t, aux_t)


# ----------------------------------------------------------------------------
# Plain-JAX post-processing (data-dependent: threshold / sort / NMS / padding)
# ----------------------------------------------------------------------------
# TODO(synk): torchvision-style NMS with dynamic output shapes has no
# fixed-shape Pallas equivalent; implemented in plain JAX with static-shape
# masking and a top-`nms_candidate_cap` cut before the O(N^2) loop.
def _per_image_postprocess(scores, classes, boxes, *, min_score_threshold,
                           nms_threshold, max_detection_num,
                           nms_candidate_cap):
    N = scores.shape[0]
    valid = scores > min_score_threshold

    masked = jnp.where(valid, scores, -jnp.inf)
    order = jnp.argsort(-masked)                  # descending, invalid last
    cap = min(N, nms_candidate_cap)
    order = order[:cap]

    s_scores = scores[order]
    s_valid = valid[order]
    s_classes = classes[order].astype(jnp.float32)
    s_boxes = boxes[order]

    x1, y1, x2, y2 = s_boxes[:, 0], s_boxes[:, 1], s_boxes[:, 2], s_boxes[:, 3]
    areas = (x2 - x1) * (y2 - y1)
    idx = jnp.arange(cap)

    def body(i, keep):
        xx1 = jnp.maximum(x1[i], x1)
        yy1 = jnp.maximum(y1[i], y1)
        xx2 = jnp.minimum(x2[i], x2)
        yy2 = jnp.minimum(y2[i], y2)
        inter = jnp.maximum(xx2 - xx1, 0.0) * jnp.maximum(yy2 - yy1, 0.0)
        iou = inter / (areas[i] + areas - inter + 1e-12)   # eps: no NaN on
        earlier_kept = keep & (idx < i)                    # degenerate boxes
        suppressed = jnp.any(earlier_kept & (iou > nms_threshold))
        keep_i = s_valid[i] & jnp.logical_not(suppressed)
        return keep.at[i].set(keep_i)

    keep = jax.lax.fori_loop(0, cap, body, jnp.zeros((cap,), jnp.bool_))

    rank = jnp.cumsum(keep.astype(jnp.int32)) - 1
    slot = jnp.where(keep & (rank < max_detection_num), rank, max_detection_num)

    out_scores = jnp.full((max_detection_num + 1,), -1.0, jnp.float32)
    out_scores = out_scores.at[slot].set(s_scores)[:max_detection_num]
    out_classes = jnp.full((max_detection_num + 1,), -1.0, jnp.float32)
    out_classes = out_classes.at[slot].set(s_classes)[:max_detection_num]
    out_boxes = jnp.full((max_detection_num + 1, 4), -1.0, jnp.float32)
    out_boxes = out_boxes.at[slot].set(s_boxes)[:max_detection_num]
    return out_scores, out_classes, out_boxes


# ----------------------------------------------------------------------------
# Positions (exact port of FCOSDecoder_mine.generate_positions_on_feature_map,
# including the permute(1, 0, 2)).
# ----------------------------------------------------------------------------
def fcos_positions(batch_size, image_w, image_h, stride):
    H = int(image_h / stride)
    W = int(image_w / stride)
    shifts_x = (jnp.arange(H, dtype=jnp.float32) + 0.5) * stride
    shifts_y = (jnp.arange(W, dtype=jnp.float32) + 0.5) * stride
    gx = jnp.broadcast_to(shifts_x[None, :], (W, H))
    gy = jnp.broadcast_to(shifts_y[:, None], (W, H))
    pos = jnp.stack([gx, gy], axis=-1)                     # [W, H, 2]
    return jnp.broadcast_to(pos[None], (batch_size, W, H, 2))


# ----------------------------------------------------------------------------
# Full decoder (mirrors FCOSDecoder_mine.forward)
# ----------------------------------------------------------------------------
def fcos_decode(cls_heads, reg_heads, center_heads, *, image_w, image_h,
                strides=(8, 16, 32, 64, 128), top_n=1000,
                min_score_threshold=0.05, nms_threshold=0.6,
                max_detection_num=100, nms_candidate_cap=1000):
    B = cls_heads[0].shape[0]
    NC = cls_heads[0].shape[-1]
    batch_positions = [fcos_positions(B, image_w, image_h, s) for s in strides]
    level_points = [h.shape[1] * h.shape[2] for h in cls_heads]

    # Fuse all FPN levels + batch into one point axis ([level][b][spatial]).
    cls_flat = jnp.concatenate([h.reshape(-1, NC) for h in cls_heads], axis=0)
    reg_flat = jnp.concatenate([h.reshape(-1, 4) for h in reg_heads], axis=0)
    ctr_flat = jnp.concatenate([h.reshape(-1, 1) for h in center_heads], axis=0)
    pos_flat = jnp.concatenate([p.reshape(-1, 2) for p in batch_positions],
                               axis=0)

    n_total = cls_flat.shape[0]
    nc_pad = ((NC + 7) // 8) * 8
    tile_n = _choose_tile_n(n_total, nc_pad)
    n_pad = ((n_total + tile_n - 1) // tile_n) * tile_n
    pad = n_pad - n_total

    # Pad class axis with very-negative logits so padded classes never win.
    if nc_pad > NC:
        cls_flat = jnp.pad(cls_flat, ((0, 0), (0, nc_pad - NC)),
                           constant_values=-1e30)
    # Single 8-row auxiliary slab: reg(4) | ctr(1) | pos(2) | valid(1).
    aux = jnp.concatenate(
        [reg_flat, ctr_flat, pos_flat, jnp.ones((n_total, 1), jnp.float32)],
        axis=1)                                              # [N, 8]
    if pad:
        cls_flat = jnp.pad(cls_flat, ((0, pad), (0, 0)))
        aux = jnp.pad(aux, ((0, pad), (0, 0)))               # tail valid = 0

    out_slab = decode_all_points_pallas(
        cls_flat.T, aux.T, image_w=image_w, image_h=image_h, tile_n=tile_n)
    scores_all = out_slab[0]
    classes_all = out_slab[1]
    boxes_all = out_slab[2:6].T                              # [Npad, 4]

    # Per-level top_n exactly as the PyTorch code (static shape condition).
    f_scores, f_classes, f_boxes = [], [], []
    offset = 0
    for P in level_points:
        n = B * P
        s = scores_all[offset:offset + n].reshape(B, P)
        c = classes_all[offset:offset + n].reshape(B, P)
        bx = boxes_all[offset:offset + n].reshape(B, P, 4)
        offset += n
        if P >= top_n:
            s, topk_idx = jax.lax.top_k(s, top_n)
            c = jnp.take_along_axis(c, topk_idx, axis=1)
            bx = jnp.take_along_axis(
                bx, jnp.broadcast_to(topk_idx[..., None],
                                     topk_idx.shape + (4,)), axis=1)
        f_scores.append(s)
        f_classes.append(c)
        f_boxes.append(bx)

    scores = jnp.concatenate(f_scores, axis=1)
    classes = jnp.concatenate(f_classes, axis=1)
    boxes = jnp.concatenate(f_boxes, axis=1)

    per_image = functools.partial(
        _per_image_postprocess,
        min_score_threshold=min_score_threshold, nms_threshold=nms_threshold,
        max_detection_num=max_detection_num,
        nms_candidate_cap=nms_candidate_cap)
    return jax.vmap(per_image)(scores, classes, boxes)


if __name__ == "__main__":
    key = jax.random.PRNGKey(0)
    B = 2
    num_classes = 8
    image_w = image_h = 128
    strides = [8, 16, 32, 64, 128]

    cls_heads, reg_heads, center_heads = [], [], []
    for stride in strides:
        H = int(image_h / stride)
        W = int(image_w / stride)
        key, k1, k2, k3 = jax.random.split(key, 4)
        cls_heads.append(jax.random.normal(k1, (B, H, W, num_classes),
                                           jnp.float32))
        reg_heads.append(0.5 * jax.random.normal(k2, (B, H, W, 4), jnp.float32))
        center_heads.append(jax.random.normal(k3, (B, H, W, 1), jnp.float32))

    batch_scores, batch_classes, batch_pred_bboxes = fcos_decode(
        cls_heads, reg_heads, center_heads,
        image_w=image_w, image_h=image_h, strides=strides,
        top_n=1000, min_score_threshold=0.05, nms_threshold=0.6,
        max_detection_num=100)

    jax.block_until_ready((batch_scores, batch_classes, batch_pred_bboxes))
    assert batch_scores.shape == (B, 100)
    assert batch_classes.shape == (B, 100)
    assert batch_pred_bboxes.shape == (B, 100, 4)
    print("KERNEL_OK")
</pallas_src>

<mosaic_0001>
module attributes {stable_mosaic.version = 11 : i64} {
  func.func @_decode_kernel(%arg0: i32, %arg1: memref<8x512xf32, #tpu.memory_space<vmem>>, %arg2: memref<8x512xf32, #tpu.memory_space<vmem>>, %arg3: memref<8x512xf32, #tpu.memory_space<vmem>>) attributes {dimension_semantics = [#tpu.dimension_semantics<parallel>], iteration_bounds = array<i64: 2>, scalar_prefetch = 0 : i64, scratch_operands = 0 : i64, tpu.core_type = #tpu.core_type<tc>, window_params = [{transform_indices = @transform_0, window_bounds = array<i64: 8, 512>}, {transform_indices = @transform_1, window_bounds = array<i64: 8, 512>}, {transform_indices = @transform_2, window_bounds = array<i64: 8, 512>}]} {
    %c0 = arith.constant 0 : index
    %c0_0 = arith.constant 0 : index
    %0 = vector.load %arg1[%c0, %c0_0] : memref<8x512xf32, #tpu.memory_space<vmem>>, vector<8x512xf32>
    %c0_1 = arith.constant 0 : index
    %c0_2 = arith.constant 0 : index
    %1 = vector.load %arg2[%c0_1, %c0_2] : memref<8x512xf32, #tpu.memory_space<vmem>>, vector<8x512xf32>
    %cst = arith.constant dense<0xFF800000> : vector<512xf32>
    %2 = vector.multi_reduction <maximumf>, %0, %cst [0] : vector<8x512xf32> to vector<512xf32>
    %3 = vector.shape_cast %2 : vector<512xf32> to vector<1x512xf32>
    %4 = tpu.iota {dimensions = array<i32: 0>} : vector<8x512xi32>
    %5 = arith.sitofp %4 : vector<8x512xi32> to vector<8x512xf32>
    %6 = vector.broadcast %3 : vector<1x512xf32> to vector<8x512xf32>
    %7 = arith.cmpf oeq, %0, %6 : vector<8x512xf32>
    %cst_3 = arith.constant 8.000000e+00 : f32
    %8 = vector.broadcast %cst_3 : f32 to vector<8x512xf32>
    %9 = arith.select %7, %5, %8 : vector<8x512xi1>, vector<8x512xf32>
    %cst_4 = arith.constant dense<0x7F800000> : vector<512xf32>
    %10 = vector.multi_reduction <minimumf>, %9, %cst_4 [0] : vector<8x512xf32> to vector<512xf32>
    %11 = vector.shape_cast %10 : vector<512xf32> to vector<1x512xf32>
    %12 = vector.extract_strided_slice %1 {offsets = [4, 0], sizes = [1, 512], strides = [1, 1]} : vector<8x512xf32> to vector<1x512xf32>
    %13 = vector.extract_strided_slice %1 {offsets = [7, 0], sizes = [1, 512], strides = [1, 1]} : vector<8x512xf32> to vector<1x512xf32>
    %cst_5 = arith.constant 0.000000e+00 : f32
    %14 = vector.broadcast %cst_5 : f32 to vector<1x512xf32>
    %15 = arith.subf %14, %3 : vector<1x512xf32>
    %16 = math.exp %15 : vector<1x512xf32>
    %cst_6 = arith.constant 1.000000e+00 : f32
    %17 = vector.broadcast %cst_6 : f32 to vector<1x512xf32>
    %18 = arith.addf %17, %16 : vector<1x512xf32>
    %19 = tpu.reciprocal %18 {approx = true} : vector<1x512xf32> -> vector<1x512xf32>
    %cst_7 = arith.constant 0.000000e+00 : f32
    %20 = vector.broadcast %cst_7 : f32 to vector<1x512xf32>
    %21 = arith.subf %20, %12 : vector<1x512xf32>
    %22 = math.exp %21 : vector<1x512xf32>
    %cst_8 = arith.constant 1.000000e+00 : f32
    %23 = vector.broadcast %cst_8 : f32 to vector<1x512xf32>
    %24 = arith.addf %23, %22 : vector<1x512xf32>
    %25 = tpu.reciprocal %24 {approx = true} : vector<1x512xf32> -> vector<1x512xf32>
    %26 = arith.mulf %19, %25 : vector<1x512xf32>
    %27 = math.sqrt %26 : vector<1x512xf32>
    %28 = arith.mulf %27, %13 : vector<1x512xf32>
    %29 = vector.extract_strided_slice %1 {offsets = [0, 0], sizes = [4, 512], strides = [1, 1]} : vector<8x512xf32> to vector<4x512xf32>
    %30 = math.exp %29 : vector<4x512xf32>
    %31 = vector.extract_strided_slice %30 {offsets = [0, 0], sizes = [1, 512], strides = [1, 1]} : vector<4x512xf32> to vector<1x512xf32>
    %32 = vector.extract_strided_slice %30 {offsets = [1, 0], sizes = [1, 512], strides = [1, 1]} : vector<4x512xf32> to vector<1x512xf32>
    %33 = vector.extract_strided_slice %30 {offsets = [2, 0], sizes = [1, 512], strides = [1, 1]} : vector<4x512xf32> to vector<1x512xf32>
    %34 = vector.extract_strided_slice %30 {offsets = [3, 0], sizes = [1, 512], strides = [1, 1]} : vector<4x512xf32> to vector<1x512xf32>
    %35 = vector.extract_strided_slice %1 {offsets = [5, 0], sizes = [1, 512], strides = [1, 1]} : vector<8x512xf32> to vector<1x512xf32>
    %36 = vector.extract_strided_slice %1 {offsets = [6, 0], sizes = [1, 512], strides = [1, 1]} : vector<8x512xf32> to vector<1x512xf32>
    %37 = arith.subf %35, %31 : vector<1x512xf32>
    %cst_9 = arith.constant 0.000000e+00 : f32
    %38 = vector.broadcast %cst_9 : f32 to vector<1x512xf32>
    %39 = arith.cmpf olt, %37, %38 : vector<1x512xf32>
    %40 = math.ceil %37 : vector<1x512xf32>
    %41 = math.floor %37 : vector<1x512xf32>
    %42 = arith.select %39, %40, %41 : vector<1x512xi1>, vector<1x512xf32>
    %cst_10 = arith.constant 0.000000e+00 : f32
    %43 = vector.broadcast %cst_10 : f32 to vector<1x512xf32>
    %44 = arith.maximumf %42, %43 : vector<1x512xf32>
    %45 = arith.subf %36, %32 : vector<1x512xf32>
    %cst_11 = arith.constant 0.000000e+00 : f32
    %46 = vector.broadcast %cst_11 : f32 to vector<1x512xf32>
    %47 = arith.cmpf olt, %45, %46 : vector<1x512xf32>
    %48 = math.ceil %45 : vector<1x512xf32>
    %49 = math.floor %45 : vector<1x512xf32>
    %50 = arith.select %47, %48, %49 : vector<1x512xi1>, vector<1x512xf32>
    %cst_12 = arith.constant 0.000000e+00 : f32
    %51 = vector.broadcast %cst_12 : f32 to vector<1x512xf32>
    %52 = arith.maximumf %50, %51 : vector<1x512xf32>
    %53 = arith.addf %35, %33 : vector<1x512xf32>
    %cst_13 = arith.constant 0.000000e+00 : f32
    %54 = vector.broadcast %cst_13 : f32 to vector<1x512xf32>
    %55 = arith.cmpf olt, %53, %54 : vector<1x512xf32>
    %56 = math.ceil %53 : vector<1x512xf32>
    %57 = math.floor %53 : vector<1x512xf32>
    %58 = arith.select %55, %56, %57 : vector<1x512xi1>, vector<1x512xf32>
    %cst_14 = arith.constant 1.270000e+02 : f32
    %59 = vector.broadcast %cst_14 : f32 to vector<1x512xf32>
    %60 = arith.minimumf %58, %59 : vector<1x512xf32>
    %61 = arith.addf %36, %34 : vector<1x512xf32>
    %cst_15 = arith.constant 0.000000e+00 : f32
    %62 = vector.broadcast %cst_15 : f32 to vector<1x512xf32>
    %63 = arith.cmpf olt, %61, %62 : vector<1x512xf32>
    %64 = math.ceil %61 : vector<1x512xf32>
    %65 = math.floor %61 : vector<1x512xf32>
    %66 = arith.select %63, %64, %65 : vector<1x512xi1>, vector<1x512xf32>
    %cst_16 = arith.constant 1.270000e+02 : f32
    %67 = vector.broadcast %cst_16 : f32 to vector<1x512xf32>
    %68 = arith.minimumf %66, %67 : vector<1x512xf32>
    %cst_17 = arith.constant 0.000000e+00 : f32
    %69 = vector.broadcast %cst_17 : f32 to vector<1x512xf32>
    %70 = tpu.concatenate %28, %11, %44, %52, %60, %68, %69, %69 in 0 : vector<1x512xf32>, vector<1x512xf32>, vector<1x512xf32>, vector<1x512xf32>, vector<1x512xf32>, vector<1x512xf32>, vector<1x512xf32>, vector<1x512xf32> -> vector<8x512xf32>
    %c0_18 = arith.constant 0 : index
    %c0_19 = arith.constant 0 : index
    %71 = vector.load %arg3[%c0_18, %c0_19] : memref<8x512xf32, #tpu.memory_space<vmem>>, vector<8x512xf32>
    tpu.vector_store %arg3[%c0_18, %c0_19], %70 {strides = array<i32>} : memref<8x512xf32, #tpu.memory_space<vmem>>, vector<8x512xf32>,
    return
  }
  func.func @transform_0(%arg0: i32) -> (i32, i32) {
    %c0_i32 = arith.constant 0 : i32
    %c0_i32_0 = arith.constant 0 : i32
    return %c0_i32, %arg0 : i32, i32
  }
  func.func @transform_1(%arg0: i32) -> (i32, i32) {
    %c0_i32 = arith.constant 0 : i32
    %c0_i32_0 = arith.constant 0 : i32
    return %c0_i32, %arg0 : i32, i32
  }
  func.func @transform_2(%arg0: i32) -> (i32, i32) {
    %c0_i32 = arith.constant 0 : i32
    %c0_i32_0 = arith.constant 0 : i32
    return %c0_i32, %arg0 : i32, i32
  }
}

</mosaic_0001>

<bundles_post_ra>
// kernel: tpu_custom_call.1
= control target key start
LH: loop header
LB: loop body
LE: loop exit
PB: predicated region body
PF: predicated region fallthrough
CT: control target
= control target key end

     0   :  { %7 = vsyncpa [#allocation3], 0  ;;  %s1233_s0 = inlined_call_operand.hbm [shape: f32[8,1024], index: 0, kind: input, shape index: {}]   ;;  %s1234_s1 = inlined_call_operand.hbm [shape: f32[8,1024], index: 1, kind: input, shape index: {}]   ;;  %s1235_s2 = inlined_call_operand.hbm [shape: f32[8,1024], index: 2, kind: output, shape index: {}]  }
   0x1   :  { %9 = vsyncpa [#allocation3 + $0x1], 0 }
   0x2   :  { %10 = vsyncpa [#allocation6], 0 }
   0x3   :  { %12 = vsyncpa [#allocation6 + $0x1], 0 }
   0x4   :  { %13 = vsyncpa [#allocation4], 0 }
   0x5   :  { %15 = vsyncpa [#allocation4 + $0x1], 0  ;;  %s879_s9 = smov 0   ;;  %s881_s10 = smov 0  }
   0x6   :  { %s883_s11 = smov 0   ;;  %s885_s12 = smov 0  }
   0x7 LB: > { %s900_s13 = sadd.s32 4294967295, %s859_s12   ;;  %s615_s14 = sadd.s32 4294967294, %s859_s12   ;;  %s859_s12 = sphi %s885_s12, %s1254_s12   ;;  %s855_s11 = sphi %s883_s11, %s1253_s11   ;;  %s851_s10 = sphi %s881_s10, %s1252_s10   ;;  %s847_s9 = sphi %s879_s9, %s1251_s9  }
   0x8   : > { %s904_s15 = sadd.s32 1, %s859_s12   ;;  %s28_s16 = sadd.s32 1, %s855_s11 }
   0x9   : > { %s25_s17 = ssub.s32 %s859_s12, %s904_s15  ;;  %p35_p0 = scmp.ne.s32.totalorder %s855_s11, %s851_s10 }
   0xa   : > { %p26_p1 = scmp.eq.s32.totalorder %s25_s17, 0  ;;  %p36_p2 = scmp.eq.s32.totalorder %s859_s12, 0 }
   0xb   : > { %p41_p3 = scmp.ne.s32.totalorder %s851_s10, %s847_s9  ;;  %p42_p4 = scmp.eq.s32.totalorder %s900_s13, 0 }
   0xc   : > { %s916_s18 = scalar_select %p26_p1, %s855_s11, %s28_s16  }
   0xd   : > { %p918_p5 = por %p36_p2, %p35_p0  ;;  %p922_p6 = por %p42_p4, %p41_p3 }
   0xe   : > { %p91_p7 = scmp.eq.s32.totalorder %s900_s13, 1  ;;  %p97_p8 = scmp.eq.s32.totalorder %s615_s14, 1 }
   0xf   : > { %s1239_s20 = scalar_select %p922_p6, 1, 0 }
  0x10   : > { %p653_p10 = scmp.lt.s32.totalorder %s859_s12, 2  ;;  %p929_p11 = por %p91_p7, %p35_p0 }
  0x11   : > { %p933_p12 = por %p97_p8, %p41_p3  ;;  %s938_s23 = sand.u32 1, %s855_s11  }
  0x12   : > { %s1240_s21 = scalar_select %p929_p11, 1, 0 }
  0x13   : > { %s1241_s22 = scalar_select %p933_p12, 1, 0 }
  0x14   : > { %s633_s24 = sshll.u32 %s859_s12, 9  ;;  %s618_s25 = sshll.u32 %s938_s23, 5 }
  0x15   : > { %s947_s28 = scalar_lea.hbm %s1233_s0, %s633_s24  ;;  %s121_s29 = scalar_lea.vmem [#allocation2], %s618_s25 }
  0x16   : > { %s129_s30 = sshll.u32 %s121_s29, 4  ;;  %p953_p13 = pnand %p653_p10, %p918_p5  ;;  %s957_s30 = int_to_ptr.vmem [resolvable:$true] %s129_s30 }
  0x17   : > { %s118_s4 = scalar_lea.sflag [#allocation3], %s938_s23  ;;  %s735_s5 = scalar_lea.hbm %s947_s28, 512 }
  0x18   : > { %p736_p2 = scmp.ne.s32.totalorder %s947_s28, %s735_s5  ;;  %p737_p3 = pneg %p953_p13 }
  0x19   : > { %s740_s8 = scalar_lea.hbm %s1233_s0, 1024  ;;  %p741_p5 = scmp.lt.s32.totalorder %s947_s28, %s1233_s0 }
  0x1a   : > { %p738_p4 = pnand %p737_p3, %p736_p2  ;;  %p742_p8 = scmp.lt.s32.totalorder %s740_s8, %s735_s5 }
  0x1c   : > { %p739_p7 = pneg %p738_p4  ;;  %p743_p10 = por %p742_p8, %p741_p5 }
  0x1e   : > { %p744_p9 = pnand %p743_p10, %p739_p7 }
  0x20   : > { %747 = shalt.err (!%p744_p9)
}
  0x21   : > { %s748_s17 = scalar_lea.vmem %s957_s30, 512  ;;  %s861_s19 = smov [#allocation2]  }
  0x22   : > { %p749_p0 = scmp.ne.s32.totalorder %s957_s30, %s748_s17  ;;  %s753_s26 = sshll.u32 %s861_s19, 4  ;;  %s754_s26 = int_to_ptr.vmem [resolvable:$false] %s753_s26 }
  0x23   : > { %s755_s27 = scalar_lea.vmem %s754_s26, 1024  ;;  %p756_p1 = scmp.lt.s32.totalorder %s957_s30, %s754_s26 }
  0x24   : > { %p751_p2 = pnand %p749_p0, %p737_p3  ;;  %p757_p12 = scmp.lt.s32.totalorder %s755_s27, %s748_s17 }
  0x26   : > { %p752_p4 = pneg %p751_p2  ;;  %p758_p11 = por %p757_p12, %p756_p1 }
  0x28   : > { %p759_p5 = pnand %p758_p11, %p752_p4 }
  0x2a   : > { %762 = shalt.err (!%p759_p5)
}
  0x2b   : > { %645 = dma.hbm_to_vmem [thread:$0]  (!%p953_p13), %s947_s28, 512, %s957_s30, %s118_s4  }
  0x2c   : > { %p1243_p9 = scmp.lt.s32.totalorder %s859_s12, 3  ;;  %p1244_p0 = scmp.ge.s32.totalorder %s859_s12, 1 }
  0x2d   : > { %s999_s7 = scalar_lea.hbm %s1234_s1, %s633_s24  ;;  %s140_s8 = scalar_lea.vmem [#allocation5], %s618_s25 }
  0x2e   : > { %p990_p7 = pnand %p1244_p0, %p1243_p9  ;;  %s148_s14 = sshll.u32 %s140_s8, 4  ;;  %s149_s14 = int_to_ptr.vmem [resolvable:$true] %s148_s14 }
  0x2f   : > { %s137_s28 = scalar_lea.sflag [#allocation6], %s938_s23  ;;  %s763_s30 = scalar_lea.hbm %s999_s7, 512 }
  0x30   : > { %s1245_s29 = scalar_select %p990_p7, 1, 0 }
  0x31   : > { %p764_p11 = scmp.ne.s32.totalorder %s999_s7, %s763_s30  ;;  %s768_s17 = scalar_lea.hbm %s1234_s1, 1024 }
  0x32   : > { %p769_p8 = scmp.lt.s32.totalorder %s999_s7, %s1234_s1  ;;  %p770_p10 = scmp.lt.s32.totalorder %s768_s17, %s763_s30 }
  0x33   : > { %p766_p12 = pnand %p764_p11, %p737_p3 }
  0x34   : > { %p771_p2 = por %p770_p10, %p769_p8 }
  0x35   : > { %p767_p1 = pneg %p766_p12 }
  0x37   : > { %p772_p4 = pnand %p771_p2, %p767_p1 }
  0x39   : > { %775 = shalt.err (!%p772_p4)
}
  0x3a   : > { %s776_s25 = scalar_lea.vmem %s149_s14, 512  ;;  %s862_s23 = smov [#allocation5]  }
  0x3b   : > { %p777_p5 = scmp.ne.s32.totalorder %s149_s14, %s776_s25  ;;  %s781_s26 = sshll.u32 %s862_s23, 4  ;;  %s782_s26 = int_to_ptr.vmem [resolvable:$false] %s781_s26 }
  0x3c   : > { %s783_s27 = scalar_lea.vmem %s782_s26, 1024  ;;  %p784_p11 = scmp.lt.s32.totalorder %s149_s14, %s782_s26 }
  0x3d   : > { %p779_p9 = pnand %p777_p5, %p737_p3  ;;  %p785_p12 = scmp.lt.s32.totalorder %s783_s27, %s776_s25 }
  0x3f   : > { %p780_p0 = pneg %p779_p9  ;;  %p786_p6 = por %p785_p12, %p784_p11 }
  0x41   : > { %p787_p7 = pnand %p786_p6, %p780_p0 }
  0x43   : > { %790 = shalt.err (!%p787_p7)
}
  0x44   : > { %648 = dma.hbm_to_vmem [thread:$0]  (!%p953_p13), %s999_s7, 512, %s149_s14, %s137_s28  }
  0x45   : > { %p1246_p1 = scmp.ne.s32.totalorder %s1245_s29, 0 }
  0x46   : > { %s1025_s5 = sand.u32 (!%p1246_p1), 1, %s851_s10   ;;  %p1247_p6 = scmp.ne.s32.totalorder (!%p1246_p1), %s1239_s20, 0 }
  0x47   : > { %157 = sbr.rel (%p1246_p1) target bundleno = 190 (0xbe), region = 28  ;;  %s1028_s6 = sshll.u32 (!%p1246_p1), %s1025_s5, 5 }
  0x48   : > { %s160_s8 = scalar_lea.sflag (!%p1246_p1), [#allocation3], %s1025_s5  ;;  %s1032_s30 = scalar_lea.vmem (!%p1246_p1), [#allocation2], %s1028_s6 }
  0x4c   : > { %834 = dma.done.wait (%p1247_p6), %s160_s8, 512  }
  0x4d   : > { %836 = vsyncadd (%p1247_p6), %s160_s8, 4294966784  ;;  %s169_s3 = scalar_lea.sflag [#allocation6], %s1025_s5  ;;  %s1040_s29 = scalar_lea.vmem [#allocation5], %s1028_s6 }
  0x4e   : > { %838 = dma.done.wait (%p1247_p6), %s169_s3, 512  }
  0x4f   : > { %840 = vsyncadd (%p1247_p6), %s169_s3, 4294966784  ;;  %v1047_v0 = vld [vmem:[%s1032_s30] sm:$0xff]  ;;  %v1053_v2 = vld [vmem:[%s1032_s30 + $0x8] sm:$0xff]  ;;  %v233_v42 = vlaneseq  ;;  %vm468_vm7 = vcmask 1040384   ;;  %vm473_vm8 = vcmask 1041408   ;;  %vm478_vm10 = vcmask 1042432  }
  0x50   : > { %v1050_v1 = vld [vmem:[%s1040_s29] sm:$0xff]  ;;  %v209_v3 = vrot.slane %v1047_v0, 4  ;;  %v1057_v4 = vld [vmem:[%s1040_s29 + $0x8] sm:$0xff]  ;;  %v215_v5 = vrot.slane %v1053_v2, 4  ;;  %v1061_v6 = vld [vmem:[%s1032_s30 + $0x10] sm:$0xff]  ;;  %vm483_vm13 = vcmask 1043456  }
  0x51   : > { %v288_v8 = vsub.f32 0.0, %v1050_v1  ;;  %v221_v9 = vrot.slane %v1061_v6, 4  ;;  %v289_v11 = vsub.f32 0.0, %v1057_v4  ;;  %v1070_v23 = vld [vmem:[%s1032_s30 + $0x18] sm:$0xff]  ;;  %v1073_v27 = vld [vmem:[%s1040_s29 + $0x10] sm:$0xff]  ;;  %v234_v49 = vshrl.u32 %v233_v42, 7 }
  0x52   : > { %v210_v7 = vmax.f32 %v1047_v0, %v209_v3  ;;  %v216_v10 = vmax.f32 %v1053_v2, %v215_v5  ;;  %v227_v29 = vrot.slane %v1070_v23, 4  ;;  %v290_v33 = vsub.f32 0.0, %v1073_v27  ;;  %v1078_v34 = vld [vmem:[%s1040_s29 + $0x18] sm:$0xff]  ;;  %s1163_s20 = scalar_lea.vmem [#allocation7], %s1028_s6  ;;  %s635_s14 = sshll.u32 %s900_s13, 9 }
  0x53   : > { %v222_v13 = vmax.f32 %v1061_v6, %v221_v9  ;;  %v292_v16 = vmul.f32 1.442695, %v288_v8  ;;  %v294_v18 = vmul.f32 1.442695, %v289_v11  ;;  %v291_v38 = vsub.f32 0.0, %v1078_v34  ;;  %s522_s7 = sshll.u32 %s1163_s20, 4  ;;  %s520_s16 = scalar_lea.hbm %s1235_s2, %s635_s14  ;;  %s1190_s7 = int_to_ptr.vmem [resolvable:$true] %s522_s7 }
  0x54   : > { %v211_v12 = vrot.slane %v210_v7, 2  ;;  %v217_v14 = vrot.slane %v216_v10, 2  ;;  %v228_v35 = vmax.f32 %v1070_v23, %v227_v29  ;;  %v296_v37 = vmul.f32 1.442695, %v290_v33  ;;  %s508_s17 = scalar_lea.sflag [#allocation4], %s1025_s5  ;;  %s791_s13 = scalar_lea.vmem %s1190_s7, 512 }
  0x55   : > { %v223_v19 = vrot.slane %v222_v13, 2  ;;  %687 = vpow2.f32 %v292_v16  ;;  %v356_v39 = vmul.f32 1.442695, %v1050_v1  ;;  %v358_v43 = vmul.f32 1.442695, %v1057_v4  ;;  %p792_p13 = scmp.ne.s32.totalorder %s1190_s7, %s791_s13  ;;  %p1248_p3 = scmp.ne.s32.totalorder %s1240_s21, 0 }
  0x56   : > { %v212_v15 = vmax.f32 %v210_v7, %v211_v12  ;;  %v218_v17 = vmax.f32 %v216_v10, %v217_v14  ;;  %689 = vpow2.f32 %v294_v18  ;;  %v229_v40 = vrot.slane %v228_v35, 2  ;;  %s863_s24 = smov [#allocation7]  }
  0x57   : > { %v224_v25 = vmax.f32 %v222_v13, %v223_v19  ;;  %v298_v46 = vmul.f32 1.442695, %v291_v38  ;;  %v1087_v56 = vcvt.s32.f32 %v234_v49  ;;  %v360_v62 = vmul.f32 1.442695, %v1073_v27  ;;  %p793_p7 = pnand %p792_p13, %p1248_p3  ;;  %s795_s19 = sshll.u32 %s863_s24, 4  ;;  %s796_s19 = int_to_ptr.vmem [resolvable:$false] %s795_s19 }
  0x58   : > { %v213_v20 = vrot.slane %v212_v15, 1  ;;  %v219_v21 = vrot.slane %v218_v17, 1  ;;  %v230_v47 = vmax.f32 %v228_v35, %v229_v40  ;;  %vm488_vm15 = vcmask 1044480   ;;  %s797_s25 = scalar_lea.vmem %s796_s19, 1024  ;;  %p798_p10 = scmp.lt.s32.totalorder %s1190_s7, %s796_s19 }
  0x59   : > { %v225_v32 = vrot.slane %v224_v25, 1  ;;  %p794_p8 = pneg %p793_p7  ;;  %p799_p2 = scmp.lt.s32.totalorder %s797_s25, %s791_s13 }
  0x5a   : > { %v214_v22 = vmax.f32 %v212_v15, %v213_v20  ;;  %v220_v24 = vmax.f32 %v218_v17, %v219_v21  ;;  %v231_v53 = vrot.slane %v230_v47, 1 }
  0x5b   : > { %v1081_v36 = vmax.f32 %v224_v25, %v225_v32  ;;  %p800_p4 = por %p799_p2, %p798_p10 }
  0x5c   : > { %v268_v26 = vsub.f32 0.0, %v214_v22  ;;  %v269_v28 = vsub.f32 0.0, %v220_v24  ;;  %v1089_v58 = vmax.f32 %v230_v47, %v231_v53  ;;  %vm236_vm0 = vcmp.eq.f32.partialorder %v1047_v0, %v214_v22 }
  0x5d   : > { %v270_v44 = vsub.f32 0.0, %v1081_v36  ;;  %v240_v60 = vsel %vm236_vm0, %v1087_v56, 8.0  ;;  %vm237_vm1 = vcmp.eq.f32.partialorder %v1053_v2, %v220_v24  ;;  %vm238_vm2 = vcmp.eq.f32.partialorder %v1061_v6, %v1081_v36  ;;  %p801_p5 = pnand %p800_p4, %p794_p8 }
  0x5e   : > { %v272_v30 = vmul.f32 1.442695, %v268_v26  ;;  %v274_v31 = vmul.f32 1.442695, %v269_v28  ;;  %v271_v59 = vsub.f32 0.0, %v1089_v58  ;;  %v244_v5 = vrot.slane %v240_v60, 4 }
  0x5f   : > { %v276_v51 = vmul.f32 1.442695, %v270_v44  ;;  %v241_v9 = vsel %vm237_vm1, %v1087_v56, 8.0  ;;  %v362_v28 = vmul.f32 1.442695, %v1078_v34  ;;  %vm239_vm11 = vcmp.eq.f32.partialorder %v1070_v23, %v1089_v58 }
  0x60   : > { %691 = vpow2.f32 %v272_v30  ;;  %v278_v63 = vmul.f32 1.442695, %v271_v59  ;;  %v245_v12 = vmin.f32 %v240_v60, %v244_v5  ;;  %v250_v15 = vrot.slane %v241_v9, 4 }
  0x61   : > { %693 = vpow2.f32 %v274_v31  ;;  %v344_v60 = vrot.slane %v1050_v1, 3  ;;  %vm493_vm1 = vcmask 1045504  }
  0x62   : > { %v688_v41 = vpop.eup %687  ;;  %695 = vpow2.f32 %v296_v37  ;;  %v246_v21 = vrot.slane %v245_v12, 2  ;;  %v251_v25 = vmin.f32 %v241_v9, %v250_v15 }
  0x63   : > { %v690_v45 = vpop.eup %689  ;;  %697 = vpow2.f32 %v356_v39  ;;  %v300_v48 = vadd.f32 1.0, %v688_v41  ;;  %v242_v41 = vsel %vm238_vm2, %v1087_v56, 8.0  ;;  %vm498_vm2 = vcmask 1046528  }
  0x64   : > { %v301_v50 = vadd.f32 1.0, %v690_v45  ;;  %699 = vpow2.f32 %v358_v43  ;;  %v247_v35 = vmin.f32 %v245_v12, %v246_v21  ;;  %v252_v40 = vrot.slane %v251_v25, 2 }
  0x65   : > { %701 = vpow2.f32 %v298_v46  ;;  %v256_v49 = vrot.slane %v242_v41, 4 }
  0x66   : > { %703 = vpow2.f32 %v276_v51  ;;  %v248_v46 = vrot.slane %v247_v35, 1 }
  0x67   : > { %705 = vrcp.f32 %v300_v48  ;;  %v253_v48 = vmin.f32 %v251_v25, %v252_v40 }
  0x68   : > { %707 = vrcp.f32 %v301_v50  ;;  %v249_v59 = vmin.f32 %v247_v35, %v248_v46 }
  0x6d   : > { %v692_v52 = vpop.eup %691 }
  0x6e   : > { %v694_v54 = vpop.eup %693  ;;  %v280_v55 = vadd.f32 1.0, %v692_v52 }
  0x6f   : > { %v281_v57 = vadd.f32 1.0, %v694_v54  ;;  %v696_v61 = vpop.eup %695 }
  0x70   : > { %709 = vrcp.f32 %v280_v55  ;;  %v698_v3 = vpop.eup %697  ;;  %v302_v7 = vadd.f32 1.0, %v696_v61 }
  0x71   : > { %711 = vrcp.f32 %v281_v57  ;;  %v700_v8 = vpop.eup %699  ;;  %v368_v10 = vrot.slane %v698_v3, 3  ;;  %v400_v14 = vrot.slane %v698_v3, 5  ;;  %v257_v3 = vmin.f32 %v242_v41, %v256_v49 }
  0x72   : > { %713 = vpow2.f32 %v278_v63  ;;  %v702_v0 = vpop.eup %701  ;;  %v369_v19 = vrot.slane %v700_v8, 3  ;;  %v401_v29 = vrot.slane %v700_v8, 5  ;;  %v254_v63 = vrot.slane %v253_v48, 1 }
  0x73   : > { %715 = vpow2.f32 %v360_v62  ;;  %v704_v11 = vpop.eup %703  ;;  %v376_v2 = vsub.f32 %v1050_v1, %v368_v10  ;;  %v408_v24 = vadd.f32 %v400_v14, %v1050_v1  ;;  %v303_v30 = vadd.f32 1.0, %v702_v0 }
  0x74   : > { %v706_v13 = vpop.eup %705  ;;  %v282_v16 = vadd.f32 1.0, %v704_v11  ;;  %717 = vrcp.f32 %v302_v7  ;;  %v377_v33 = vsub.f32 %v1057_v4, %v369_v19  ;;  %v409_v42 = vadd.f32 %v401_v29, %v1057_v4 }
  0x75   : > { %v708_v17 = vpop.eup %707  ;;  %v384_v31 = vceil.f32 %v376_v2  ;;  %v388_v32 = vfloor.f32 %v376_v2  ;;  %vm380_vm3 = vcmp.lt.f32.partialorder %v376_v2, 0.0  ;;  %v416_v38 = vceil.f32 %v408_v24 }
  0x76   : > { %719 = vrcp.f32 %v282_v16  ;;  %v420_v39 = vfloor.f32 %v408_v24  ;;  %vm412_vm4 = vcmp.lt.f32.partialorder %v408_v24, 0.0  ;;  %v385_v44 = vceil.f32 %v377_v33 }
  0x77   : > { %v392_v36 = vsel %vm380_vm3, %v384_v31, %v388_v32  ;;  %v389_v45 = vfloor.f32 %v377_v33  ;;  %vm381_vm5 = vcmp.lt.f32.partialorder %v377_v33, 0.0  ;;  %v417_v52 = vceil.f32 %v409_v42 }
  0x78   : > { %v424_v47 = vsel %vm412_vm4, %v416_v38, %v420_v39  ;;  %v396_v51 = vmax.f32 %v392_v36, 0.0  ;;  %v421_v53 = vfloor.f32 %v409_v42  ;;  %vm413_vm6 = vcmp.lt.f32.partialorder %v409_v42, 0.0 }
  0x79   : > { %v393_v55 = vsel %vm381_vm5, %v385_v44, %v389_v45  ;;  %v428_v61 = vmin.f32 %v424_v47, 127.0  ;;  %v345_v62 = vrot.slane %v1057_v4, 3  ;;  %v258_v15 = vrot.slane %v257_v3, 2 }
  0x7a   : > { %v448_v8 = vrot.slane %v396_v51, 3  ;;  %v397_v9 = vmax.f32 %v393_v55, 0.0  ;;  %v425_v0 = vsel %vm413_vm6, %v417_v52, %v421_v53  ;;  %v255_v2 = vmin.f32 %v253_v48, %v254_v63 }
  0x7b   : > { %v429_v19 = vmin.f32 %v425_v0, 127.0  ;;  %v259_v35 = vmin.f32 %v257_v3, %v258_v15 }
  0x7c   : > { %v449_v25 = vrot.slane %v397_v9, 3 }
  0x7d   : > { %v710_v18 = vpop.eup %709  ;;  %v260_v45 = vrot.slane %v259_v35, 1 }
  0x7e   : > { %v712_v20 = vpop.eup %711  ;;  %v1098_v22 = vmul.f32 %v710_v18, %v706_v13  ;;  %v460_v18 = vrot.slane %v428_v61, 1 }
  0x7f   : > { %v1101_v26 = vmul.f32 %v712_v20, %v708_v17  ;;  %v714_v37 = vpop.eup %713  ;;  %v261_v0 = vmin.f32 %v259_v35, %v260_v45 }
  0x80   : > { %721 = vrsqrt.f32 %v1098_v22  ;;  %v283_v43 = vadd.f32 1.0, %v714_v37  ;;  %v716_v6 = vpop.eup %715  ;;  %vm314_vm9 = vcmp.eq.f32.partialorder %v1098_v22, inf  ;;  %v317_v1 = vand.u32 2147483648, %v1098_v22 }
  0x81   : > { %723 = vrsqrt.f32 %v1101_v26  ;;  %v718_v50 = vpop.eup %717  ;;  %v370_v54 = vrot.slane %v716_v6, 3  ;;  %v402_v7 = vrot.slane %v716_v6, 5  ;;  %vm316_vm12 = vcmp.eq.f32.partialorder %v1098_v22, 0.0 }
  0x82   : > { %725 = vrcp.f32 %v303_v30  ;;  %vm321_vm14 = vcmp.eq.f32.partialorder %v1101_v26, inf  ;;  %v324_v13 = vand.u32 2147483648, %v1101_v26  ;;  %vm323_vm0 = vcmp.eq.f32.partialorder %v1101_v26, 0.0 }
  0x83   : > { %727 = vpow2.f32 %v362_v28  ;;  %v720_v57 = vpop.eup %719  ;;  %v378_v10 = vsub.f32 %v1073_v27, %v370_v54  ;;  %v410_v16 = vadd.f32 %v402_v7, %v1073_v27  ;;  %v243_v28 = vsel %vm239_vm11, %v1087_v56, 8.0 }
  0x84   : > { %729 = vrcp.f32 %v283_v43  ;;  %v1113_v5 = vmul.f32 %v720_v57, %v718_v50  ;;  %v262_v41 = vrot.slane %v243_v28, 4  ;;  %v346_v6 = vrot.slane %v1073_v27, 3 }
  0x85   : > { %vm382_vm3 = vcmp.lt.f32.partialorder %v378_v10, 0.0  ;;  %v386_v31 = vceil.f32 %v378_v10  ;;  %v390_v37 = vfloor.f32 %v378_v10  ;;  %v418_v38 = vceil.f32 %v410_v16 }
  0x86   : > { %731 = vrsqrt.f32 %v1113_v5  ;;  %v422_v40 = vfloor.f32 %v410_v16  ;;  %vm414_vm4 = vcmp.lt.f32.partialorder %v410_v16, 0.0  ;;  %v263_v50 = vmin.f32 %v243_v28, %v262_v41 }
  0x87   : > { %v394_v46 = vsel %vm382_vm3, %v386_v31, %v390_v37  ;;  %vm328_vm5 = vcmp.eq.f32.partialorder %v1113_v5, inf  ;;  %vm330_vm6 = vcmp.eq.f32.partialorder %v1113_v5, 0.0 }
  0x88   : > { %v426_v49 = vsel %vm414_vm4, %v418_v38, %v422_v40  ;;  %v398_v7 = vmax.f32 %v394_v46, 0.0 }
  0x8a   : > { %v450_v16 = vrot.slane %v398_v7, 3 }
  0x8d   : > { %v722_v11 = vpop.eup %721 }
  0x8e   : > { %v724_v4 = vpop.eup %723  ;;  %v313_v12 = vmul.f32 %v722_v11, %v1098_v22 }
  0x8f   : > { %v320_v14 = vmul.f32 %v724_v4, %v1101_v26  ;;  %v726_v20 = vpop.eup %725 }
  0x90   : > { %v315_v17 = vsel %vm314_vm9, %v1098_v22, %v313_v12  ;;  %v728_v29 = vpop.eup %727 }
  0x91   : > { %v318_v21 = vsel %vm316_vm12, %v317_v1, %v315_v17  ;;  %v322_v24 = vsel %vm321_vm14, %v1101_v26, %v320_v14  ;;  %v730_v32 = vpop.eup %729  ;;  %v371_v23 = vrot.slane %v728_v29, 3  ;;  %v403_v56 = vrot.slane %v728_v29, 5 }
  0x92   : > { %v352_v30 = vmul.f32 %v344_v60, %v318_v21  ;;  %v325_v22 = vsel %vm323_vm0, %v324_v13, %v322_v24  ;;  %v1138_v42 = vmul.f32 %v730_v32, %v726_v20  ;;  %v461_v26 = vrot.slane %v429_v19, 1 }
  0x93   : > { %v353_v33 = vmul.f32 %v345_v62, %v325_v22  ;;  %v379_v27 = vsub.f32 %v1078_v34, %v371_v23  ;;  %v411_v53 = vadd.f32 %v403_v56, %v1078_v34  ;;  %v732_v54 = vpop.eup %731  ;;  %v430_v1 = vmin.f32 %v426_v49, 127.0 }
  0x94   : > { %v436_v39 = vrot.slane %v352_v30, 4  ;;  %733 = vrsqrt.f32 %v1138_v42  ;;  %v327_v62 = vmul.f32 %v732_v54, %v1113_v5  ;;  %v347_v19 = vrot.slane %v1078_v34, 3 }
  0x95   : > { %v437_v43 = vrot.slane %v353_v33, 4  ;;  %v387_v4 = vceil.f32 %v379_v27  ;;  %v391_v12 = vfloor.f32 %v379_v27  ;;  %vm383_vm9 = vcmp.lt.f32.partialorder %v379_v27, 0.0 }
  0x96   : > { %v469_v58 = vsel %vm468_vm7, %v436_v39, %v249_v59  ;;  %v331_v59 = vand.u32 2147483648, %v1113_v5  ;;  %v329_v10 = vsel %vm328_vm5, %v1113_v5, %v327_v62  ;;  %v419_v14 = vceil.f32 %v411_v53 }
  0x97   : > { %v474_v36 = vsel %vm473_vm8, %v469_v58, %v448_v8  ;;  %v470_v44 = vsel %vm468_vm7, %v437_v43, %v255_v2  ;;  %v423_v15 = vfloor.f32 %v411_v53  ;;  %vm415_vm11 = vcmp.lt.f32.partialorder %v411_v53, 0.0 }
  0x98   : > { %v479_v47 = vsel %vm478_vm10, %v474_v36, %v448_v8  ;;  %v475_v48 = vsel %vm473_vm8, %v470_v44, %v449_v25  ;;  %v264_v8 = vrot.slane %v263_v50, 2  ;;  %v332_v11 = vsel %vm330_vm6, %v331_v59, %v329_v10 }
  0x99   : > { %v484_v51 = vsel %vm483_vm13, %v479_v47, %v460_v18  ;;  %v480_v52 = vsel %vm478_vm10, %v475_v48, %v449_v25  ;;  %v354_v13 = vmul.f32 %v346_v6, %v332_v11  ;;  %v462_v2 = vrot.slane %v430_v1, 1 }
  0x9a   : > { %v489_v55 = vsel %vm488_vm15, %v484_v51, %v460_v18  ;;  %v485_v57 = vsel %vm483_vm13, %v480_v52, %v461_v26  ;;  %v265_v17 = vmin.f32 %v263_v50, %v264_v8  ;;  %v395_v20 = vsel %vm383_vm9, %v387_v4, %v391_v12 }
  0x9b   : > { %v494_v60 = vsel %vm493_vm1, %v489_v55, 0.0  ;;  %v490_v61 = vsel %vm488_vm15, %v485_v57, %v461_v26  ;;  %v438_v18 = vrot.slane %v354_v13, 4  ;;  %vm335_vm12 = vcmp.eq.f32.partialorder %v1138_v42, inf }
  0x9c   : > { %v499_v63 = vsel %vm498_vm2, %v494_v60, 0.0  ;;  %v495_v3 = vsel %vm493_vm1, %v490_v61, 0.0  ;;  %v338_v24 = vand.u32 2147483648, %v1138_v42  ;;  %v427_v25 = vsel %vm415_vm11, %v419_v14, %v423_v15 }
  0x9d   : > { %503 = vst [vmem:[%s1163_s20] sm:$0xff] %v499_v63  ;;  %v500_v9 = vsel %vm498_vm2, %v495_v3, 0.0  ;;  %v471_v5 = vsel %vm468_vm7, %v438_v18, %v261_v0  ;;  %v266_v29 = vrot.slane %v265_v17, 1  ;;  %vm337_vm14 = vcmp.eq.f32.partialorder %v1138_v42, 0.0 }
  0x9e   : > { %504 = vst [vmem:[%s1163_s20 + $0x8] sm:$0xff] %v500_v9  ;;  %v476_v28 = vsel %vm473_vm8, %v471_v5, %v450_v16  ;;  %v399_v34 = vmax.f32 %v395_v20, 0.0  ;;  %v431_v37 = vmin.f32 %v427_v25, 127.0 }
  0x9f   : > { %v481_v22 = vsel %vm478_vm10, %v476_v28, %v450_v16  ;;  %v267_v39 = vmin.f32 %v265_v17, %v266_v29 }
  0xa0   : > { %v486_v31 = vsel %vm483_vm13, %v481_v22, %v462_v2  ;;  %v451_v43 = vrot.slane %v399_v34, 3  ;;  %v463_v56 = vrot.slane %v431_v37, 1 }
  0xa1   : > { %v734_v21 = vpop.eup %733  ;;  %v491_v33 = vsel %vm488_vm15, %v486_v31, %v462_v2 }
  0xa2   : > { %v334_v30 = vmul.f32 %v734_v21, %v1138_v42  ;;  %v496_v38 = vsel %vm493_vm1, %v491_v33, 0.0 }
  0xa3   : > { %v501_v41 = vsel %vm498_vm2, %v496_v38, 0.0 }
  0xa4   : > { %v336_v32 = vsel %vm335_vm12, %v1138_v42, %v334_v30  ;;  %505 = vst [vmem:[%s1163_s20 + $0x10] sm:$0xff] %v501_v41 }
  0xa5   : > { %v339_v35 = vsel %vm337_vm14, %v338_v24, %v336_v32 }
  0xa6   : > { %v355_v40 = vmul.f32 %v347_v19, %v339_v35 }
  0xa8   : > { %v439_v23 = vrot.slane %v355_v40, 4 }
  0xaa   : > { %v472_v42 = vsel %vm468_vm7, %v439_v23, %v267_v39 }
  0xab   : > { %v477_v58 = vsel %vm473_vm8, %v472_v42, %v451_v43 }
  0xac   : > { %v482_v26 = vsel %vm478_vm10, %v477_v58, %v451_v43 }
  0xad   : > { %v487_v6 = vsel %vm483_vm13, %v482_v26, %v463_v56 }
  0xae   : > { %v492_v36 = vsel %vm488_vm15, %v487_v6, %v463_v56 }
  0xaf   : > { %v497_v44 = vsel %vm493_vm1, %v492_v36, 0.0 }
  0xb0   : > { %v502_v45 = vsel %vm498_vm2, %v497_v44, 0.0 }
  0xb1   : > { %506 = vst [vmem:[%s1163_s20 + $0x18] sm:$0xff] %v502_v45 }
  0xb2   : > { %804 = shalt.err (!%p801_p5)
}
  0xb3   : > { %s805_s23 = scalar_lea.hbm %s520_s16, 512  ;;  %s809_s5 = scalar_lea.hbm %s1235_s2, 1024 }
  0xb4   : > { %p806_p9 = scmp.ne.s32.totalorder %s520_s16, %s805_s23  ;;  %p810_p12 = scmp.lt.s32.totalorder %s520_s16, %s1235_s2 }
  0xb5   : > { %p811_p1 = scmp.lt.s32.totalorder %s809_s5, %s805_s23 }
  0xb6   : > { %p807_p0 = pnand %p806_p9, %p1248_p3 }
  0xb7   : > { %p812_p6 = por %p811_p1, %p810_p12 }
  0xb8   : > { %p808_p11 = pneg %p807_p0 }
  0xba   : > { %p813_p13 = pnand %p812_p6, %p808_p11 }
  0xbc   : > { %816 = shalt.err (!%p813_p13)
}
  0xbd   : > { %640 = dma.vmem_to_hbm [thread:$0]  (%p1248_p3), %s1190_s7, 512, %s520_s16, %s508_s17  }
  0xbe PF: > { %s534_s30 = sand.u32 1, %s847_s9   ;;  %p1249_p7 = scmp.ne.s32.totalorder %s1241_s22, 0 }
  0xbf   : > { %p1250_p8 = scmp.ge.s32.totalorder %s859_s12, 2  ;;  %s535_s3 = scalar_lea.sflag [#allocation4], %s534_s30 }
  0xc1   : > { %p650_p10 = pnand %p1250_p8, %p1249_p7 }
  0xc3   : > { %p651_p2 = pneg %p650_p10 }
  0xc5   : > { %842 = dma.done.wait (%p651_p2), %s535_s3, 512  }
  0xc6   : > { %844 = vsyncadd (%p651_p2), %s535_s3, 4294966784  ;;  %p18_p4 = scmp.ge.s32.totalorder %s904_s15, 4   ;;  %s1251_s9 = smov %s851_s10 }
  0xc7   : > { %s1252_s10 = smov %s855_s11  ;;  %s1253_s11 = smov %s916_s18 }
  0xc8   : > { %s1254_s12 = smov %s904_s15  ;;  %20 = sbr.rel (!%p18_p4) target bundleno = 7 (0x7), region = 86 }
  0xcd   :  { %540 = vsyncpa [#allocation3], 1 }
  0xce   :  { %542 = vsyncpa [#allocation3 + $0x1], 1 }
  0xcf   :  { %543 = vsyncpa [#allocation6], 1 }
  0xd0   :  { %545 = vsyncpa [#allocation6 + $0x1], 1 }
  0xd1   :  { %546 = vsyncpa [#allocation4], 1 }
  0xd2   :  { %548 = vsyncpa [#allocation4 + $0x1], 1 }

</bundles_post_ra>
